<compile_context>
chip_gen: v7x
topology: tpu7x:2x2x1
jax: 0.10.0
libtpu: 0.0.40
codegen_flags: <defaults>
</compile_context>

<pallas_src>
import functools

import jax
import jax.numpy as jnp
from jax import lax
from jax.experimental import pallas as pl
from jax.experimental.pallas import tpu as pltpu

_EPS = 1e-5


def _round_up(x, m):
    return ((x + m - 1) // m) * m


def _vmem_limit_bytes():
    """VMEM request with headroom below physical capacity.

    On v5e/v6e (128 MiB physical) this returns 64 MiB (well above the scoped
    default); on v7x (64 MiB/TC) it returns 56 MiB, leaving room for compiler
    scratch/spills.
    """
    try:
        cap = int(pltpu.get_tpu_info().vmem_capacity_bytes)
    except Exception:  # conservative fallback
        cap = 128 * 1024 * 1024
    return int(min(cap - 8 * 1024 * 1024, 64 * 1024 * 1024))


# ----------------------------------------------------------------------------
# Stage 1: LayerNorm -> 1x1 conv + GLU -> depthwise conv -> partial BN stats
# ----------------------------------------------------------------------------
def _stage1_kernel(x_ref, lnw_ref, lnb_ref, w1_ref, wd_ref,
                   yd_ref, stats_ref, *, ks):
    x = x_ref[0].astype(jnp.float32)                    # (T, D)
    T = x.shape[0]

    # LayerNorm over channels (f32 statistics).
    mu = jnp.mean(x, axis=-1, keepdims=True)
    var = jnp.mean(jnp.square(x - mu), axis=-1, keepdims=True)
    xh = (x - mu) * lax.rsqrt(var + _EPS)
    xh = xh * lnw_ref[...] + lnb_ref[...]               # (T, D) * (1, D)

    # Fused 1x1 conv (D -> 2C): ONE MXU matmul, then split halves for GLU.
    ag = jnp.dot(xh.astype(jnp.bfloat16), w1_ref[...],
                 preferred_element_type=jnp.float32)    # (T, 2C) f32
    C = ag.shape[1] // 2
    yg = ag[:, :C] * jax.nn.sigmoid(ag[:, C:])          # GLU, (T, C)

    # Depthwise conv over time with SAME zero padding (cross-correlation).
    # Shifted contributions via XLU roll; cheap single-sided edge mask built
    # from a (T, 1) iota (the other bound can never fail for a static offset).
    pad = (ks - 1) // 2
    wd = wd_ref[...].astype(jnp.float32)                # (ks, C)
    tidx = lax.broadcasted_iota(jnp.int32, (T, 1), 0)   # (T, 1)
    acc = jnp.zeros((T, C), jnp.float32)
    for j in range(ks):
        off = j - pad                                    # static
        tap = wd[j:j + 1, :]                             # (1, C)
        if off == 0:
            acc = acc + yg * tap
        else:
            shifted = pltpu.roll(yg, shift=(-off) % T, axis=0)  # yg[t + off]
            if off > 0:
                valid = tidx < (T - off)
            else:
                valid = tidx >= (-off)
            acc = acc + jnp.where(valid, shifted, 0.0) * tap

    # bf16 intermediate: halves HBM traffic of the stage1 -> stage2 hop.
    yd_ref[0] = acc.astype(yd_ref.dtype)

    # Per-batch BatchNorm partials: (mean, M2) reduced in f32 (before the
    # bf16 cast), combined with Chan's formula in the wrapper.
    mean_b = jnp.mean(acc, axis=0, keepdims=True)                    # (1, C)
    m2_b = jnp.sum(jnp.square(acc - mean_b), axis=0, keepdims=True)  # (1, C)
    stats_ref[0] = jnp.concatenate([mean_b, m2_b], axis=0)           # (2, C)


# ----------------------------------------------------------------------------
# Stage 2: BatchNorm affine (global stats) -> SiLU -> 1x1 conv (C -> C)
# ----------------------------------------------------------------------------
def _stage2_kernel(y_ref, scale_ref, shift_ref, w3_ref, o_ref):
    y = y_ref[...].astype(jnp.float32)                  # (tn, C), bf16 -> f32
    yn = y * scale_ref[...] + shift_ref[...]            # folded BN affine
    ys = yn * jax.nn.sigmoid(yn)                        # SiLU
    o_ref[...] = jnp.dot(ys.astype(jnp.bfloat16), w3_ref[...],
                         preferred_element_type=jnp.float32).astype(o_ref.dtype)


# ----------------------------------------------------------------------------
# Wrapper
# ----------------------------------------------------------------------------
@functools.partial(jax.jit, static_argnames=("ks",))
def convolution_module_forward(x, params, *, ks):
    """ConvolutionModule.forward: (B, T, D) -> (B, T, num_channels)."""
    B, T, D = x.shape
    C = params["w3_t"].shape[0]
    vmem_limit = _vmem_limit_bytes()

    w1_bf = params["w1_t"].astype(jnp.bfloat16)         # (D, 2C)
    w3_bf = params["w3_t"].astype(jnp.bfloat16)         # (C, C)

    # ---- stage 1 ----
    stage1_cost = pl.CostEstimate(
        flops=int(B * T * (2 * D * (2 * C) + C * (2 * ks + 8) + 4 * D)),
        transcendentals=int(B * T * C),
        bytes_accessed=int(B * T * D * 4 + B * T * C * 2 + B * 2 * C * 4
                           + D * 2 * C * 2 + ks * C * 4 + 4 * D * 4),
    )
    yd, stats = pl.pallas_call(
        functools.partial(_stage1_kernel, ks=ks),
        out_shape=(jax.ShapeDtypeStruct((B, T, C), jnp.bfloat16),
                   jax.ShapeDtypeStruct((B, 2, C), jnp.float32)),
        grid_spec=pltpu.PrefetchScalarGridSpec(
            num_scalar_prefetch=0,
            grid=(B,),
            in_specs=[
                pl.BlockSpec((1, T, D), lambda b: (b, 0, 0)),
                pl.BlockSpec((1, D), lambda b: (0, 0)),
                pl.BlockSpec((1, D), lambda b: (0, 0)),
                pl.BlockSpec((D, 2 * C), lambda b: (0, 0)),
                pl.BlockSpec((ks, C), lambda b: (0, 0)),
            ],
            out_specs=[
                pl.BlockSpec((1, T, C), lambda b: (b, 0, 0)),
                pl.BlockSpec((1, 2, C), lambda b: (b, 0, 0)),
            ],
        ),
        compiler_params=pltpu.CompilerParams(
            dimension_semantics=("parallel",),
            vmem_limit_bytes=vmem_limit),
        cost_estimate=stage1_cost,
    )(x, params["ln_w"], params["ln_b"], w1_bf, params["wd"])

    # ---- global BatchNorm statistics (training mode, biased variance) ----
    # Chan/Welford combine of per-batch (mean, M2): numerically stable.
    mean_b = stats[:, 0, :]                              # (B, C)
    m2_b = stats[:, 1, :]                                # (B, C)
    mean = jnp.mean(mean_b, axis=0)                      # (C,)
    m2 = jnp.sum(m2_b, axis=0) + T * jnp.sum(
        jnp.square(mean_b - mean[None, :]), axis=0)
    var = m2 / (B * T)
    scale = params["bn_w"] * lax.rsqrt(var + _EPS)       # (C,)
    shift = params["bn_b"] - mean * scale                # (C,)
    # TODO(synk): running_mean/running_var buffer updates (module state) are
    # not produced; only the training-mode forward output is computed.

    # ---- stage 2 over flattened (B*T, C) rows: lane/sublane-dense tiles ----
    N = B * T
    tn = max(8, min(1024, _round_up(N, 8)))              # big row tile
    n_pad = _round_up(N, tn)                              # pad, never (N, C) block
    yd_flat = yd.reshape(N, C)
    if n_pad != N:
        yd_flat = jnp.pad(yd_flat, ((0, n_pad - N), (0, 0)))

    stage2_cost = pl.CostEstimate(
        flops=int(n_pad * (2 * C * C + 4 * C)),
        transcendentals=int(n_pad * C),
        bytes_accessed=int(n_pad * C * 2 + n_pad * C * 4 + C * C * 2 + 2 * C * 4),
    )
    out_flat = pl.pallas_call(
        _stage2_kernel,
        out_shape=jax.ShapeDtypeStruct((n_pad, C), jnp.float32),
        grid_spec=pltpu.PrefetchScalarGridSpec(
            num_scalar_prefetch=0,
            grid=(n_pad // tn,),
            in_specs=[
                pl.BlockSpec((tn, C), lambda i: (i, 0)),
                pl.BlockSpec((1, C), lambda i: (0, 0)),
                pl.BlockSpec((1, C), lambda i: (0, 0)),
                pl.BlockSpec((C, C), lambda i: (0, 0)),
            ],
            out_specs=pl.BlockSpec((tn, C), lambda i: (i, 0)),
        ),
        compiler_params=pltpu.CompilerParams(
            dimension_semantics=("parallel",),
            vmem_limit_bytes=vmem_limit),
        cost_estimate=stage2_cost,
    )(yd_flat, scale[None, :], shift[None, :], w3_bf)

    return out_flat[:N].reshape(B, T, C)


# ----------------------------------------------------------------------------
# Deterministic parameter init (shapes follow the PyTorch module __init__;
# kaiming_normal fan_out, 'linear' gain, bias=False everywhere).
# ----------------------------------------------------------------------------
def init_params(key, *, input_dim, num_channels, ks):
    D, C = input_dim, num_channels
    k1, k2, k3 = jax.random.split(key, 3)
    w1 = jax.random.normal(k1, (2 * C, D), jnp.float32) / jnp.sqrt(2.0 * C)
    wd = jax.random.normal(k2, (C, ks), jnp.float32) / jnp.sqrt(float(ks))
    w3 = jax.random.normal(k3, (C, C), jnp.float32) / jnp.sqrt(float(C))
    return {
        "ln_w": jnp.ones((1, D), jnp.float32),
        "ln_b": jnp.zeros((1, D), jnp.float32),
        # fused GLU weight: columns [0:C] = value half, [C:2C] = gate half
        "w1_t": jnp.asarray(w1.T, jnp.float32),          # (D, 2C)
        "wd": jnp.asarray(wd.T, jnp.float32),            # (ks, C)
        "bn_w": jnp.ones((C,), jnp.float32),
        "bn_b": jnp.zeros((C,), jnp.float32),
        "w3_t": jnp.asarray(w3.T, jnp.float32),          # (C_in, C_out)
    }


# ----------------------------------------------------------------------------
# Pure-JAX reference (same bf16 matmul / bf16-intermediate casts as the
# kernel) — validates the roll-based depthwise shift and BN-stats split.
# ----------------------------------------------------------------------------
def _reference_forward(x, params, ks):
    B, T, D = x.shape
    C = params["w3_t"].shape[0]
    xf = x.astype(jnp.float32)
    mu = jnp.mean(xf, axis=-1, keepdims=True)
    var = jnp.mean(jnp.square(xf - mu), axis=-1, keepdims=True)
    xh = (xf - mu) * lax.rsqrt(var + _EPS)
    xh = xh * params["ln_w"][0] + params["ln_b"][0]
    ag = jnp.dot(xh.astype(jnp.bfloat16),
                 params["w1_t"].astype(jnp.bfloat16),
                 preferred_element_type=jnp.float32)
    yg = ag[..., :C] * jax.nn.sigmoid(ag[..., C:])
    pad = (ks - 1) // 2
    ygp = jnp.pad(yg, ((0, 0), (pad, pad), (0, 0)))
    wd = params["wd"].astype(jnp.float32)                # (ks, C)
    yd = sum(ygp[:, j:j + T, :] * wd[j][None, None, :] for j in range(ks))
    mean = jnp.mean(yd, axis=(0, 1))                     # stats from f32
    bvar = jnp.mean(jnp.square(yd - mean), axis=(0, 1))
    ydb = yd.astype(jnp.bfloat16).astype(jnp.float32)    # bf16 intermediate
    yn = (ydb - mean) * params["bn_w"] * lax.rsqrt(bvar + _EPS) + params["bn_b"]
    ys = yn * jax.nn.sigmoid(yn)
    return jnp.dot(ys.astype(jnp.bfloat16),
                   params["w3_t"].astype(jnp.bfloat16),
                   preferred_element_type=jnp.float32)


if __name__ == "__main__":
    B, T, D, C, ks = 4, 16, 16, 32, 3

    key = jax.random.PRNGKey(0)
    kx, kp = jax.random.split(key)
    x = jax.random.normal(kx, (B, T, D), jnp.float32)
    params = init_params(kp, input_dim=D, num_channels=C, ks=ks)

    out = convolution_module_forward(x, params, ks=ks)
    out = jax.block_until_ready(out)
    assert out.shape == (B, T, C)
    assert bool(jnp.all(jnp.isfinite(out)))

    ref = _reference_forward(x, params, ks)
    max_err = float(jnp.max(jnp.abs(out - ref)))
    assert max_err < 2e-2, f"max abs error vs reference: {max_err}"
    print("KERNEL_OK")
</pallas_src>

<mosaic_0001>
module attributes {stable_mosaic.version = 11 : i64} {
  func.func @_stage1_kernel(%arg0: i32, %arg1: memref<1x16x16xf32, #tpu.memory_space<vmem>>, %arg2: memref<1x16xf32, #tpu.memory_space<vmem>>, %arg3: memref<1x16xf32, #tpu.memory_space<vmem>>, %arg4: memref<16x64xbf16, #tpu.memory_space<vmem>>, %arg5: memref<3x32xf32, #tpu.memory_space<vmem>>, %arg6: memref<1x16x32xbf16, #tpu.memory_space<vmem>>, %arg7: memref<1x2x32xf32, #tpu.memory_space<vmem>>) attributes {dimension_semantics = [#tpu.dimension_semantics<parallel>], iteration_bounds = array<i64: 4>, scalar_prefetch = 0 : i64, scratch_operands = 0 : i64, tpu.core_type = #tpu.core_type<tc>, window_params = [{transform_indices = @transform_0, window_bounds = array<i64: 1, 16, 16>}, {pipeline_mode = #tpu.pipeline_mode<synchronous>, transform_indices = @transform_1, window_bounds = array<i64: 1, 16>}, {pipeline_mode = #tpu.pipeline_mode<synchronous>, transform_indices = @transform_2, window_bounds = array<i64: 1, 16>}, {pipeline_mode = #tpu.pipeline_mode<synchronous>, transform_indices = @transform_3, window_bounds = array<i64: 16, 64>}, {pipeline_mode = #tpu.pipeline_mode<synchronous>, transform_indices = @transform_4, window_bounds = array<i64: 3, 32>}, {transform_indices = @transform_5, window_bounds = array<i64: 1, 16, 32>}, {transform_indices = @transform_6, window_bounds = array<i64: 1, 2, 32>}]} {
    %c0 = arith.constant 0 : index
    %c0_0 = arith.constant 0 : index
    %c0_1 = arith.constant 0 : index
    %0 = vector.load %arg1[%c0, %c0_0, %c0_1] : memref<1x16x16xf32, #tpu.memory_space<vmem>>, vector<1x16x16xf32>
    %1 = vector.shape_cast %0 : vector<1x16x16xf32> to vector<16x16xf32>
    %cst = arith.constant dense<0.000000e+00> : vector<16xf32>
    %2 = vector.multi_reduction <add>, %1, %cst [1] : vector<16x16xf32> to vector<16xf32>
    %3 = vector.shape_cast %2 : vector<16xf32> to vector<16x1xf32>
    %cst_2 = arith.constant 1.600000e+01 : f32
    %4 = vector.broadcast %cst_2 : f32 to vector<16x1xf32>
    %5 = arith.divf %3, %4 : vector<16x1xf32>
    %6 = vector.broadcast %5 : vector<16x1xf32> to vector<16x16xf32>
    %7 = arith.subf %1, %6 : vector<16x16xf32>
    %8 = arith.mulf %7, %7 : vector<16x16xf32>
    %cst_3 = arith.constant dense<0.000000e+00> : vector<16xf32>
    %9 = vector.multi_reduction <add>, %8, %cst_3 [1] : vector<16x16xf32> to vector<16xf32>
    %10 = vector.shape_cast %9 : vector<16xf32> to vector<16x1xf32>
    %cst_4 = arith.constant 1.600000e+01 : f32
    %11 = vector.broadcast %cst_4 : f32 to vector<16x1xf32>
    %12 = arith.divf %10, %11 : vector<16x1xf32>
    %13 = vector.broadcast %5 : vector<16x1xf32> to vector<16x16xf32>
    %14 = arith.subf %1, %13 : vector<16x16xf32>
    %cst_5 = arith.constant 9.99999974E-6 : f32
    %15 = vector.broadcast %cst_5 : f32 to vector<16x1xf32>
    %16 = arith.addf %12, %15 : vector<16x1xf32>
    %17 = math.rsqrt %16 : vector<16x1xf32>
    %18 = vector.broadcast %17 : vector<16x1xf32> to vector<16x16xf32>
    %19 = arith.mulf %14, %18 : vector<16x16xf32>
    %c0_6 = arith.constant 0 : index
    %c0_7 = arith.constant 0 : index
    %20 = vector.load %arg2[%c0_6, %c0_7] : memref<1x16xf32, #tpu.memory_space<vmem>>, vector<1x16xf32>
    %21 = vector.broadcast %20 : vector<1x16xf32> to vector<16x16xf32>
    %22 = arith.mulf %19, %21 : vector<16x16xf32>
    %c0_8 = arith.constant 0 : index
    %c0_9 = arith.constant 0 : index
    %23 = vector.load %arg3[%c0_8, %c0_9] : memref<1x16xf32, #tpu.memory_space<vmem>>, vector<1x16xf32>
    %24 = vector.broadcast %23 : vector<1x16xf32> to vector<16x16xf32>
    %25 = arith.addf %22, %24 : vector<16x16xf32>
    %26 = arith.truncf %25 : vector<16x16xf32> to vector<16x16xbf16>
    %c0_10 = arith.constant 0 : index
    %c0_11 = arith.constant 0 : index
    %27 = vector.load %arg4[%c0_10, %c0_11] : memref<16x64xbf16, #tpu.memory_space<vmem>>, vector<16x64xbf16>
    %cst_12 = arith.constant dense<0.000000e+00> : vector<16x64xf32>
    %28 = tpu.matmul %26, %27, %cst_12 {dimension_numbers = #tpu.dot_dimension_numbers<[1], [0], [0], [1], [0, 0, 1, 1], [], []>} : vector<16x16xbf16>, vector<16x64xbf16>, vector<16x64xf32> -> vector<16x64xf32>
    %29 = vector.extract_strided_slice %28 {offsets = [0, 0], sizes = [16, 32], strides = [1, 1]} : vector<16x64xf32> to vector<16x32xf32>
    %30 = vector.extract_strided_slice %28 {offsets = [0, 32], sizes = [16, 32], strides = [1, 1]} : vector<16x64xf32> to vector<16x32xf32>
    %31 = arith.negf %30 : vector<16x32xf32>
    %32 = math.exp %31 : vector<16x32xf32>
    %cst_13 = arith.constant 1.000000e+00 : f32
    %33 = vector.broadcast %cst_13 : f32 to vector<16x32xf32>
    %34 = arith.addf %33, %32 : vector<16x32xf32>
    %35 = arith.divf %33, %34 : vector<16x32xf32>
    %36 = arith.mulf %29, %35 : vector<16x32xf32>
    %c0_14 = arith.constant 0 : index
    %c0_15 = arith.constant 0 : index
    %37 = vector.load %arg5[%c0_14, %c0_15] : memref<3x32xf32, #tpu.memory_space<vmem>>, vector<3x32xf32>
    %38 = tpu.iota {dimensions = array<i32: 0>} : vector<16x1xi32>
    %cst_16 = arith.constant 0.000000e+00 : f32
    %39 = vector.broadcast %cst_16 : f32 to vector<16x32xf32>
    %40 = vector.extract_strided_slice %37 {offsets = [0, 0], sizes = [1, 32], strides = [1, 1]} : vector<3x32xf32> to vector<1x32xf32>
    %c1_i32 = arith.constant 1 : i32
    %41 = tpu.dynamic_rotate %36 by %c1_i32 dim 0 : vector<16x32xf32>, i32 -> vector<16x32xf32>
    %c1_i32_17 = arith.constant 1 : i32
    %42 = vector.broadcast %c1_i32_17 : i32 to vector<16x1xi32>
    %43 = arith.cmpi sge, %38, %42 : vector<16x1xi32>
    %cst_18 = arith.constant 0.000000e+00 : f32
    %44 = vector.shape_cast %43 : vector<16x1xi1> to vector<16x1xi1>
    %45 = vector.broadcast %44 : vector<16x1xi1> to vector<16x32xi1>
    %46 = vector.broadcast %cst_18 : f32 to vector<16x32xf32>
    %47 = arith.select %45, %41, %46 : vector<16x32xi1>, vector<16x32xf32>
    %48 = vector.broadcast %40 : vector<1x32xf32> to vector<16x32xf32>
    %49 = arith.mulf %47, %48 : vector<16x32xf32>
    %50 = arith.addf %39, %49 : vector<16x32xf32>
    %51 = vector.extract_strided_slice %37 {offsets = [1, 0], sizes = [1, 32], strides = [1, 1]} : vector<3x32xf32> to vector<1x32xf32>
    %52 = vector.broadcast %51 : vector<1x32xf32> to vector<16x32xf32>
    %53 = arith.mulf %36, %52 : vector<16x32xf32>
    %54 = arith.addf %50, %53 : vector<16x32xf32>
    %55 = vector.extract_strided_slice %37 {offsets = [2, 0], sizes = [1, 32], strides = [1, 1]} : vector<3x32xf32> to vector<1x32xf32>
    %c15_i32 = arith.constant 15 : i32
    %56 = tpu.dynamic_rotate %36 by %c15_i32 dim 0 : vector<16x32xf32>, i32 -> vector<16x32xf32>
    %c15_i32_19 = arith.constant 15 : i32
    %57 = vector.broadcast %c15_i32_19 : i32 to vector<16x1xi32>
    %58 = arith.cmpi slt, %38, %57 : vector<16x1xi32>
    %cst_20 = arith.constant 0.000000e+00 : f32
    %59 = vector.shape_cast %58 : vector<16x1xi1> to vector<16x1xi1>
    %60 = vector.broadcast %59 : vector<16x1xi1> to vector<16x32xi1>
    %61 = vector.broadcast %cst_20 : f32 to vector<16x32xf32>
    %62 = arith.select %60, %56, %61 : vector<16x32xi1>, vector<16x32xf32>
    %63 = vector.broadcast %55 : vector<1x32xf32> to vector<16x32xf32>
    %64 = arith.mulf %62, %63 : vector<16x32xf32>
    %65 = arith.addf %54, %64 : vector<16x32xf32>
    %66 = arith.truncf %65 : vector<16x32xf32> to vector<16x32xbf16>
    %c0_21 = arith.constant 0 : index
    %c0_22 = arith.constant 0 : index
    %c0_23 = arith.constant 0 : index
    %67 = vector.load %arg6[%c0_21, %c0_22, %c0_23] : memref<1x16x32xbf16, #tpu.memory_space<vmem>>, vector<1x16x32xbf16>
    %68 = vector.shape_cast %67 : vector<1x16x32xbf16> to vector<16x32xbf16>
    %69 = vector.shape_cast %66 : vector<16x32xbf16> to vector<1x16x32xbf16>
    tpu.vector_store %arg6[%c0_21, %c0_22, %c0_23], %69 {strides = array<i32>} : memref<1x16x32xbf16, #tpu.memory_space<vmem>>, vector<1x16x32xbf16>,
    %cst_24 = arith.constant dense<0.000000e+00> : vector<32xf32>
    %70 = vector.multi_reduction <add>, %65, %cst_24 [0] : vector<16x32xf32> to vector<32xf32>
    %71 = vector.shape_cast %70 : vector<32xf32> to vector<1x32xf32>
    %cst_25 = arith.constant 1.600000e+01 : f32
    %72 = vector.broadcast %cst_25 : f32 to vector<1x32xf32>
    %73 = arith.divf %71, %72 : vector<1x32xf32>
    %74 = vector.broadcast %73 : vector<1x32xf32> to vector<16x32xf32>
    %75 = arith.subf %65, %74 : vector<16x32xf32>
    %76 = arith.mulf %75, %75 : vector<16x32xf32>
    %cst_26 = arith.constant dense<0.000000e+00> : vector<32xf32>
    %77 = vector.multi_reduction <add>, %76, %cst_26 [0] : vector<16x32xf32> to vector<32xf32>
    %78 = vector.shape_cast %77 : vector<32xf32> to vector<1x32xf32>
    %79 = tpu.concatenate %73, %78 in 0 : vector<1x32xf32>, vector<1x32xf32> -> vector<2x32xf32>
    %c0_27 = arith.constant 0 : index
    %c0_28 = arith.constant 0 : index
    %c0_29 = arith.constant 0 : index
    %80 = vector.load %arg7[%c0_27, %c0_28, %c0_29] : memref<1x2x32xf32, #tpu.memory_space<vmem>>, vector<1x2x32xf32>
    %81 = vector.shape_cast %80 : vector<1x2x32xf32> to vector<2x32xf32>
    %82 = vector.shape_cast %79 : vector<2x32xf32> to vector<1x2x32xf32>
    tpu.vector_store %arg7[%c0_27, %c0_28, %c0_29], %82 {strides = array<i32>} : memref<1x2x32xf32, #tpu.memory_space<vmem>>, vector<1x2x32xf32>,
    return
  }
  func.func @transform_0(%arg0: i32) -> (i32, i32, i32) {
    %c0_i32 = arith.constant 0 : i32
    %c0_i32_0 = arith.constant 0 : i32
    %c0_i32_1 = arith.constant 0 : i32
    return %arg0, %c0_i32, %c0_i32_0 : i32, i32, i32
  }
  func.func @transform_1(%arg0: i32) -> (i32, i32) {
    %c0_i32 = arith.constant 0 : i32
    %c0_i32_0 = arith.constant 0 : i32
    %c0_i32_1 = arith.constant 0 : i32
    return %c0_i32, %c0_i32_0 : i32, i32
  }
  func.func @transform_2(%arg0: i32) -> (i32, i32) {
    %c0_i32 = arith.constant 0 : i32
    %c0_i32_0 = arith.constant 0 : i32
    %c0_i32_1 = arith.constant 0 : i32
    return %c0_i32, %c0_i32_0 : i32, i32
  }
  func.func @transform_3(%arg0: i32) -> (i32, i32) {
    %c0_i32 = arith.constant 0 : i32
    %c0_i32_0 = arith.constant 0 : i32
    %c0_i32_1 = arith.constant 0 : i32
    return %c0_i32, %c0_i32_0 : i32, i32
  }
  func.func @transform_4(%arg0: i32) -> (i32, i32) {
    %c0_i32 = arith.constant 0 : i32
    %c0_i32_0 = arith.constant 0 : i32
    %c0_i32_1 = arith.constant 0 : i32
    return %c0_i32, %c0_i32_0 : i32, i32
  }
  func.func @transform_5(%arg0: i32) -> (i32, i32, i32) {
    %c0_i32 = arith.constant 0 : i32
    %c0_i32_0 = arith.constant 0 : i32
    %c0_i32_1 = arith.constant 0 : i32
    return %arg0, %c0_i32, %c0_i32_0 : i32, i32, i32
  }
  func.func @transform_6(%arg0: i32) -> (i32, i32, i32) {
    %c0_i32 = arith.constant 0 : i32
    %c0_i32_0 = arith.constant 0 : i32
    %c0_i32_1 = arith.constant 0 : i32
    return %arg0, %c0_i32, %c0_i32_0 : i32, i32, i32
  }
}

module attributes {stable_mosaic.version = 11 : i64} {
  func.func @_stage2_kernel(%arg0: i32, %arg1: memref<64x32xbf16, #tpu.memory_space<vmem>>, %arg2: memref<1x32xf32, #tpu.memory_space<vmem>>, %arg3: memref<1x32xf32, #tpu.memory_space<vmem>>, %arg4: memref<32x32xbf16, #tpu.memory_space<vmem>>, %arg5: memref<64x32xf32, #tpu.memory_space<vmem>>) attributes {dimension_semantics = [#tpu.dimension_semantics<parallel>], iteration_bounds = array<i64: 1>, scalar_prefetch = 0 : i64, scratch_operands = 0 : i64, tpu.core_type = #tpu.core_type<tc>, window_params = [{transform_indices = @transform_0, window_bounds = array<i64: 64, 32>}, {pipeline_mode = #tpu.pipeline_mode<synchronous>, transform_indices = @transform_1, window_bounds = array<i64: 1, 32>}, {pipeline_mode = #tpu.pipeline_mode<synchronous>, transform_indices = @transform_2, window_bounds = array<i64: 1, 32>}, {pipeline_mode = #tpu.pipeline_mode<synchronous>, transform_indices = @transform_3, window_bounds = array<i64: 32, 32>}, {transform_indices = @transform_4, window_bounds = array<i64: 64, 32>}]} {
    %c0 = arith.constant 0 : index
    %c0_0 = arith.constant 0 : index
    %0 = vector.load %arg1[%c0, %c0_0] : memref<64x32xbf16, #tpu.memory_space<vmem>>, vector<64x32xbf16>
    %1 = arith.extf %0 : vector<64x32xbf16> to vector<64x32xf32>
    %c0_1 = arith.constant 0 : index
    %c0_2 = arith.constant 0 : index
    %2 = vector.load %arg2[%c0_1, %c0_2] : memref<1x32xf32, #tpu.memory_space<vmem>>, vector<1x32xf32>
    %3 = vector.broadcast %2 : vector<1x32xf32> to vector<64x32xf32>
    %4 = arith.mulf %1, %3 : vector<64x32xf32>
    %c0_3 = arith.constant 0 : index
    %c0_4 = arith.constant 0 : index
    %5 = vector.load %arg3[%c0_3, %c0_4] : memref<1x32xf32, #tpu.memory_space<vmem>>, vector<1x32xf32>
    %6 = vector.broadcast %5 : vector<1x32xf32> to vector<64x32xf32>
    %7 = arith.addf %4, %6 : vector<64x32xf32>
    %8 = arith.negf %7 : vector<64x32xf32>
    %9 = math.exp %8 : vector<64x32xf32>
    %cst = arith.constant 1.000000e+00 : f32
    %10 = vector.broadcast %cst : f32 to vector<64x32xf32>
    %11 = arith.addf %10, %9 : vector<64x32xf32>
    %12 = arith.divf %10, %11 : vector<64x32xf32>
    %13 = arith.mulf %7, %12 : vector<64x32xf32>
    %14 = arith.truncf %13 : vector<64x32xf32> to vector<64x32xbf16>
    %c0_5 = arith.constant 0 : index
    %c0_6 = arith.constant 0 : index
    %15 = vector.load %arg4[%c0_5, %c0_6] : memref<32x32xbf16, #tpu.memory_space<vmem>>, vector<32x32xbf16>
    %cst_7 = arith.constant dense<0.000000e+00> : vector<64x32xf32>
    %16 = tpu.matmul %14, %15, %cst_7 {dimension_numbers = #tpu.dot_dimension_numbers<[1], [0], [0], [1], [0, 0, 1, 1], [], []>} : vector<64x32xbf16>, vector<32x32xbf16>, vector<64x32xf32> -> vector<64x32xf32>
    %c0_8 = arith.constant 0 : index
    %c0_9 = arith.constant 0 : index
    %17 = vector.load %arg5[%c0_8, %c0_9] : memref<64x32xf32, #tpu.memory_space<vmem>>, vector<64x32xf32>
    tpu.vector_store %arg5[%c0_8, %c0_9], %16 {strides = array<i32>} : memref<64x32xf32, #tpu.memory_space<vmem>>, vector<64x32xf32>,
    return
  }
  func.func @transform_0(%arg0: i32) -> (i32, i32) {
    %c0_i32 = arith.constant 0 : i32
    %c0_i32_0 = arith.constant 0 : i32
    return %arg0, %c0_i32 : i32, i32
  }
  func.func @transform_1(%arg0: i32) -> (i32, i32) {
    %c0_i32 = arith.constant 0 : i32
    %c0_i32_0 = arith.constant 0 : i32
    %c0_i32_1 = arith.constant 0 : i32
    return %c0_i32, %c0_i32_0 : i32, i32
  }
  func.func @transform_2(%arg0: i32) -> (i32, i32) {
    %c0_i32 = arith.constant 0 : i32
    %c0_i32_0 = arith.constant 0 : i32
    %c0_i32_1 = arith.constant 0 : i32
    return %c0_i32, %c0_i32_0 : i32, i32
  }
  func.func @transform_3(%arg0: i32) -> (i32, i32) {
    %c0_i32 = arith.constant 0 : i32
    %c0_i32_0 = arith.constant 0 : i32
    %c0_i32_1 = arith.constant 0 : i32
    return %c0_i32, %c0_i32_0 : i32, i32
  }
  func.func @transform_4(%arg0: i32) -> (i32, i32) {
    %c0_i32 = arith.constant 0 : i32
    %c0_i32_0 = arith.constant 0 : i32
    return %arg0, %c0_i32 : i32, i32
  }
}

</mosaic_0001>

<bundles_post_ra>
// kernel: convolution_module_forward.2
= control target key start
LH: loop header
LB: loop body
LE: loop exit
PB: predicated region body
PF: predicated region fallthrough
CT: control target
= control target key end

     0   :  { %12 = vsyncpa [#allocation3], 0  ;;  %s1494_s0 = inlined_call_operand.hbm [shape: f32[4,16,16], index: 0, kind: input, shape index: {}]   ;;  %s1495_s1 = inlined_call_operand.hbm [shape: f32[1,16], index: 1, kind: input, shape index: {}]   ;;  %s1496_s2 = inlined_call_operand.hbm [shape: f32[1,16], index: 2, kind: input, shape index: {}]   ;;  %s1497_s3 = inlined_call_operand.hbm [shape: bf16[16,64], index: 3, kind: input, shape index: {}]   ;;  %s1498_s4 = inlined_call_operand.hbm [shape: f32[3,32], index: 4, kind: input, shape index: {}]   ;;  %s1499_s5 = inlined_call_operand.hbm [shape: bf16[4,16,32], index: 5, kind: output, shape index: {0}]   ;;  %s1500_s6 = inlined_call_operand.hbm [shape: f32[4,2,32], index: 6, kind: output, shape index: {1}]  }
   0x1   :  { %14 = vsyncpa [#allocation3 + $0x1], 0 }
   0x2   :  { %15 = vsyncpa [#allocation6], 0 }
   0x3   :  { %16 = vsyncpa [#allocation9], 0 }
   0x4   :  { %17 = vsyncpa [#allocation4], 0 }
   0x5   :  { %19 = vsyncpa [#allocation4 + $0x1], 0 }
   0x6   :  { %20 = vsyncpa [#allocation13], 0 }
   0x7   :  { %22 = vsyncpa [#allocation13 + $0x1], 0  ;;  %s1185_s21 = smov 0   ;;  %s1187_s22 = smov 0  }
   0x8   :  { %s1189_s23 = smov 0   ;;  %s1191_s24 = smov 0  }
   0x9 LB: > { %s1206_s25 = sadd.s32 4294967295, %s1132_s24   ;;  %s725_s26 = sadd.s32 4294967294, %s1132_s24   ;;  %s1132_s24 = sphi %s1191_s24, %s1522_s24   ;;  %s1128_s23 = sphi %s1189_s23, %s1521_s23   ;;  %s1124_s22 = sphi %s1187_s22, %s1520_s22   ;;  %s1120_s21 = sphi %s1185_s21, %s1519_s21  }
   0xa   : > { %p48_p0 = scmp.ne.s32.totalorder %s1124_s22, %s1120_s21  ;;  %p1501_p1 = scmp.eq.s32.totalorder %s1206_s25, 0 }
   0xb   : > { %p162_p3 = scmp.eq.s32.totalorder %s725_s26, 3  ;;  %p726_p5 = scmp.ge.s32.totalorder %s1132_s24, 1 }
   0xc   : > { %p1215_p4 = por %p1501_p1, %p48_p0  ;;  %p195_p7 = scmp.lt.s32.totalorder %s1132_s24, 5 }
   0xd   : > { %p1220_p6 = por %p162_p3, %p48_p0  ;;  %s1134_s30 = smov [#allocation5]  }
   0xe   : > { %s1504_s27 = scalar_select %p1215_p4, 1, 0 }
   0xf   : > { %s1505_s28 = scalar_select %p1220_p6, 1, 0 }
  0x10   : > { %p1225_p8 = pnand %p726_p5, %p195_p7  ;;  %s208_s7 = sshll.u32 %s1134_s30, 4  ;;  %s209_s7 = int_to_ptr.vmem [resolvable:$true] %s208_s7 }
  0x11   : > { %s1135_s8 = smov [#allocation8]   ;;  %s1136_s11 = smov [#allocation7]  }
  0x12   : > { %s1506_s29 = scalar_select %p1225_p8, 1, 0 }
  0x13   : > { %p792_p9 = pneg %p1225_p8  ;;  %s229_s9 = sshll.u32 %s1135_s8, 4  ;;  %s1237_s9 = int_to_ptr.vmem [resolvable:$true] %s229_s9 }
  0x14   : > { %s1239_s12 = sshll.u32 %s1136_s11, 4  ;;  %s884_s15 = scalar_lea.hbm %s1495_s1, 16  ;;  %s220_s12 = int_to_ptr.vmem [resolvable:$true] %s1239_s12 }
  0x15   : > { %p1233_p10 = pnand %p792_p9, %p1501_p1  ;;  %p885_p11 = scmp.ne.s32.totalorder %s1495_s1, %s884_s15 }
  0x16   : > { %p891_p3 = scmp.lt.u32.totalorder %s884_s15, %s1495_s1 }
  0x17   : > { %p1249_p12 = pneg %p1233_p10 }
  0x19   : > { %p887_p13 = pnand %p1249_p12, %p885_p11 }
  0x1b   : > { %p888_p0 = pneg %p887_p13 }
  0x1d   : > { %p893_p5 = pnand %p891_p3, %p888_p0 }
  0x1f   : > { %896 = shalt.err (!%p893_p5)
}
  0x20   : > { %s897_s26 = scalar_lea.vmem %s209_s7, 16  ;;  %s904_s30 = scalar_lea.vmem %s209_s7, 32 }
  0x21   : > { %p898_p7 = scmp.ne.s32.totalorder %s209_s7, %s897_s26  ;;  %p905_p2 = scmp.lt.s32.totalorder %s209_s7, %s209_s7 }
  0x22   : > { %p906_p6 = scmp.lt.s32.totalorder %s904_s30, %s897_s26 }
  0x23   : > { %p900_p9 = pnand %p898_p7, %p1249_p12 }
  0x24   : > { %p907_p4 = por %p906_p6, %p905_p2 }
  0x25   : > { %p901_p1 = pneg %p900_p9 }
  0x27   : > { %p908_p8 = pnand %p907_p4, %p901_p1 }
  0x29   : > { %911 = shalt.err (!%p908_p8)
}
  0x2a   : > { %795 = dma.hbm_to_vmem [thread:$0]  (!%p1233_p10), %s1495_s1, 16, %s209_s7, [#allocation6]  }
  0x2b   : > { %s912_s15 = scalar_lea.hbm %s1497_s3, 128 }
  0x2c   : > { %p913_p11 = scmp.ne.s32.totalorder %s1497_s3, %s912_s15  ;;  %p919_p1 = scmp.lt.u32.totalorder %s912_s15, %s1497_s3 }
  0x2e   : > { %p915_p13 = pnand %p913_p11, %p1249_p12 }
  0x30   : > { %p916_p2 = pneg %p915_p13 }
  0x32   : > { %p921_p4 = pnand %p919_p1, %p916_p2 }
  0x34   : > { %924 = shalt.err (!%p921_p4)
}
  0x35   : > { %s925_s7 = scalar_lea.vmem %s1237_s9, 128  ;;  %p933_p3 = scmp.lt.s32.totalorder %s1237_s9, %s1237_s9 }
  0x36   : > { %p926_p6 = scmp.ne.s32.totalorder %s1237_s9, %s925_s7  ;;  %p934_p5 = scmp.lt.s32.totalorder %s925_s7, %s925_s7 }
  0x38   : > { %p928_p8 = pnand %p926_p6, %p1249_p12  ;;  %p935_p7 = por %p934_p5, %p933_p3 }
  0x3a   : > { %p929_p0 = pneg %p928_p8 }
  0x3c   : > { %p936_p9 = pnand %p935_p7, %p929_p0 }
  0x3e   : > { %939 = shalt.err (!%p936_p9)
}
  0x3f   : > { %s1137_s26 = smov 64   ;;  %s1138_s30 = smov 4  }
  0x40   : > { %801 = dma.hbm_to_vmem [thread:$0]  (!%p1233_p10), %s1497_s3, 128, %s1237_s9, [#allocation9], %s1137_s26, %s1137_s26, %s1138_s30  }
  0x41   : > { %s940_s15 = scalar_lea.hbm %s1496_s2, 16 }
  0x42   : > { %p941_p11 = scmp.ne.s32.totalorder %s1496_s2, %s940_s15  ;;  %p947_p1 = scmp.lt.u32.totalorder %s940_s15, %s1496_s2 }
  0x44   : > { %p943_p13 = pnand %p941_p11, %p1249_p12 }
  0x46   : > { %p944_p2 = pneg %p943_p13 }
  0x48   : > { %p949_p4 = pnand %p947_p1, %p944_p2 }
  0x4a   : > { %952 = shalt.err (!%p949_p4)
}
  0x4b   : > { %s953_s7 = scalar_lea.vmem %s220_s12, 16  ;;  %s960_s9 = scalar_lea.vmem %s220_s12, 32 }
  0x4c   : > { %p954_p6 = scmp.ne.s32.totalorder %s220_s12, %s953_s7  ;;  %p961_p3 = scmp.lt.s32.totalorder %s220_s12, %s220_s12 }
  0x4d   : > { %p962_p5 = scmp.lt.s32.totalorder %s960_s9, %s953_s7 }
  0x4e   : > { %p956_p8 = pnand %p954_p6, %p1249_p12 }
  0x4f   : > { %p963_p7 = por %p962_p5, %p961_p3 }
  0x50   : > { %p957_p0 = pneg %p956_p8 }
  0x52   : > { %p964_p9 = pnand %p963_p7, %p957_p0 }
  0x54   : > { %967 = shalt.err (!%p964_p9)
}
  0x55   : > { %798 = dma.hbm_to_vmem [thread:$0]  (!%p1233_p10), %s1496_s2, 16, %s220_s12, [#allocation6]  }
  0x56   : > { %s1139_s8 = smov [#allocation10]   ;;  %s968_s15 = scalar_lea.hbm %s1498_s4, 64 }
  0x57   : > { %s243_s11 = sshll.u32 %s1139_s8, 4  ;;  %p969_p11 = scmp.ne.s32.totalorder %s1498_s4, %s968_s15  ;;  %s244_s11 = int_to_ptr.vmem [resolvable:$true] %s243_s11 }
  0x58   : > { %p975_p1 = scmp.lt.u32.totalorder %s968_s15, %s1498_s4 }
  0x59   : > { %p971_p13 = pnand %p969_p11, %p1249_p12 }
  0x5b   : > { %p972_p2 = pneg %p971_p13 }
  0x5d   : > { %p977_p4 = pnand %p975_p1, %p972_p2 }
  0x5f   : > { %980 = shalt.err (!%p977_p4)
}
  0x60   : > { %s981_s12 = scalar_lea.vmem %s244_s11, 64  ;;  %p989_p3 = scmp.lt.s32.totalorder %s244_s11, %s244_s11 }
  0x61   : > { %p982_p6 = scmp.ne.s32.totalorder %s244_s11, %s981_s12  ;;  %p990_p5 = scmp.lt.s32.totalorder %s981_s12, %s981_s12 }
  0x63   : > { %p984_p8 = pnand %p982_p6, %p1249_p12  ;;  %p991_p7 = por %p990_p5, %p989_p3 }
  0x65   : > { %p985_p0 = pneg %p984_p8 }
  0x67   : > { %p992_p9 = pnand %p991_p7, %p985_p0 }
  0x69   : > { %995 = shalt.err (!%p992_p9)
}
  0x6a   : > { %804 = dma.hbm_to_vmem [thread:$0]  (!%p1233_p10), %s1498_s4, 64, %s244_s11, [#allocation9]  }
  0x6b   : > { %s1326_s18 = sadd.s32 1, %s1132_s24   ;;  %s35_s26 = sadd.s32 1, %s1128_s23 }
  0x6c   : > { %s32_s10 = ssub.s32 %s1132_s24, %s1326_s18  ;;  %p42_p12 = scmp.ne.s32.totalorder %s1128_s23, %s1124_s22 }
  0x6d   : > { %p33_p11 = scmp.eq.s32.totalorder %s32_s10, 0  ;;  %p43_p13 = scmp.eq.s32.totalorder %s1132_s24, 0 }
  0x6e   : > { %p1509_p2 = scmp.eq.s32.totalorder %s1206_s25, 3  ;;  %p820_p4 = scmp.lt.s32.totalorder %s1132_s24, 4 }
  0x6f   : > { %s1342_s8 = scalar_select %p33_p11, %s1128_s23, %s35_s26  }
  0x70   : > { %p1336_p1 = por %p1509_p2, %p42_p12  ;;  %p44_p6 = por %p43_p13, %p42_p12 }
  0x71   : > { %s254_s13 = sand.u32 1, %s1128_s23   ;;  %s758_s11 = sshll.u32 %s1132_s24, 8 }
  0x72   : > { %s732_s14 = sshll.u32 %s254_s13, 4  ;;  %s1349_s17 = scalar_lea.hbm %s1494_s0, %s758_s11 }
  0x73   : > { %s258_s19 = scalar_lea.vmem [#allocation2], %s732_s14  ;;  %p1353_p10 = pnand %p820_p4, %p44_p6 }
  0x74   : > { %s265_s20 = sshll.u32 %s258_s19, 4  ;;  %s1357_s7 = scalar_lea.sflag [#allocation3], %s254_s13  ;;  %s1351_s20 = int_to_ptr.vmem [resolvable:$true] %s265_s20 }
  0x75   : > { %s996_s9 = scalar_lea.hbm %s1349_s17, 256  ;;  %p998_p0 = pneg %p1353_p10 }
  0x76   : > { %p997_p8 = scmp.ne.s32.totalorder %s1349_s17, %s996_s9  ;;  %s1001_s14 = scalar_lea.hbm %s1494_s0, 1024 }
  0x77   : > { %p1002_p7 = scmp.lt.u32.totalorder %s1349_s17, %s1494_s0  ;;  %p1003_p9 = scmp.lt.u32.totalorder %s1001_s14, %s996_s9 }
  0x78   : > { %p999_p3 = pnand %p998_p0, %p997_p8  ;;  %p1005_p11 = scmp.lt.u32.totalorder %s996_s9, %s1349_s17 }
  0x79   : > { %p1004_p12 = por %p1003_p9, %p1002_p7 }
  0x7a   : > { %p1000_p5 = pneg %p999_p3 }
  0x7b   : > { %p1006_p13 = por %p1005_p11, %p1004_p12 }
  0x7d   : > { %p1007_p2 = pnand %p1006_p13, %p1000_p5 }
  0x7f   : > { %1010 = shalt.err (!%p1007_p2)
}
  0x80   : > { %s1011_s13 = scalar_lea.vmem %s1351_s20, 256  ;;  %s1140_s16 = smov [#allocation2]  }
  0x81   : > { %p1012_p4 = scmp.ne.s32.totalorder %s1351_s20, %s1011_s13  ;;  %s1016_s19 = sshll.u32 %s1140_s16, 4  ;;  %s1017_s19 = int_to_ptr.vmem [resolvable:$false] %s1016_s19 }
  0x82   : > { %s1018_s26 = scalar_lea.vmem %s1017_s19, 512  ;;  %p1019_p3 = scmp.lt.s32.totalorder %s1351_s20, %s1017_s19 }
  0x83   : > { %p1014_p6 = pnand %p1012_p4, %p998_p0  ;;  %p1020_p7 = scmp.lt.s32.totalorder %s1018_s26, %s1011_s13 }
  0x85   : > { %p1015_p8 = pneg %p1014_p6  ;;  %p1021_p9 = por %p1020_p7, %p1019_p3 }
  0x87   : > { %p1022_p12 = pnand %p1021_p9, %p1015_p8 }
  0x89   : > { %1025 = shalt.err (!%p1022_p12)
}
  0x8a   : > { %s1141_s9 = smov 128   ;;  %s1142_s10 = smov 8  }
  0x8b   : > { %808 = dma.hbm_to_vmem [thread:$0]  (!%p1353_p10), %s1349_s17, 256, %s1351_s20, %s1357_s7, %s1141_s9, %s1141_s9, %s1142_s10  }
  0x8c   : > { %p1512_p0 = scmp.ne.s32.totalorder %s1506_s29, 0 }
  0x8d   : > { %s1388_s14 = sand.u32 (!%p1512_p0), 1, %s1124_s22   ;;  %p1513_p5 = scmp.ne.s32.totalorder (!%p1512_p0), %s1504_s27, 0 }
  0x8e   : > { %277 = sbr.rel (%p1512_p0) target bundleno = 906 (0x38a), region = 40  ;;  %s736_s11 = sshll.u32 (!%p1512_p0), %s1388_s14, 4 }
  0x8f   : > { %s280_s15 = scalar_lea.sflag (!%p1512_p0), [#allocation3], %s1388_s14  ;;  %s283_s13 = scalar_lea.vmem (!%p1512_p0), [#allocation2], %s736_s11 }
  0x95   : > { %1099 = dma.done.wait (%p1513_p5), %s280_s15, 256  }
  0x96   : > { %1101 = vsyncadd (%p1513_p5), %s280_s15, 4294967040  ;;  %p1514_p11 = scmp.eq.s32.totalorder %s1206_s25, 0 }
  0x98   : > { %1103 = dma.done.wait (%p1514_p11), [#allocation6], 32   ;;  %p1515_p10 = pmov %p1514_p11 }
  0x9a   : > { %1105 = vsyncadd (%p1515_p10), [#allocation6], 4294967264  ;;  %p1516_p13 = pmov %p1515_p10 }
  0x9b   : > { %p1517_p2 = pmov %p1515_p10 }
  0x9c   : > { %1107 = dma.done.wait (%p1516_p13), [#allocation9], 192  }
  0x9d   : > { %1109 = vsyncadd (%p1517_p2), [#allocation9], 4294967104  ;;  %vm336_vm0 = vcmask 130048   ;;  %v334_v0 = vld [vmem:[%s283_s13] sm:$0xff]  ;;  %v335_v1 = vld [vmem:[%s283_s13 + $0x8] sm:$0xff]  ;;  %v1143_v15 = vmov 0.0   ;;  %v458_v45 = vlaneseq }
  0x9e   : > { %v337_v2 = vsel %vm336_vm0, %v334_v0, 0.0  ;;  %v340_v3 = vsel %vm336_vm0, %v335_v1, 0.0  ;;  %v871_v14 = vld [vmem:[#allocation8] sm:$0xff]   ;;  %764 = vmatprep.subr.bf16.mxu0 %v1143_v15  ;;  %vm1144_vm1 = vmmov 0   ;;  %v743_v24 = vld [vmem:[#allocation5] ss:$0 sm:$0xff] }
  0x9f   : > { %338 = vadd.xlane.f32.xlu0 %v337_v2  ;;  %766 = vmatprep.mubr.msk.bf16.mxu0 %vm1144_vm1, %v1143_v15  ;;  %v744_v28 = vld [vmem:[#allocation7] ss:$0 sm:$0xff]  ;;  %s1145_s27 = smov 96   ;;  %v459_v46 = vshrl.u32 %v458_v45, 7  ;;  %v457_v49 = vld [vmem:[#allocation10] sm:$0x7] }
  0xa0   : > { %765 = vmatpush3.bf16.msra.mxu0 %v871_v14  ;;  %s741_s29 = sshll.u32 %s1388_s14, 3  ;;  %vm522_vm6 = vcmask 261120   ;;  %s761_s17 = sshll.u32 %s1206_s25, 7  ;;  %vm519_vm7 = vcmask 257024  }
  0xa1   : > { %v484_v47 = vsub.s32 1, %v459_v46  ;;  %v505_v48 = vsub.s32 2, %v459_v46  ;;  %v460_v51 = vadd.s32 8, %v459_v46  ;;  %v476_v52 = vsub.s32 0, %v459_v46  ;;  %s325_s20 = scalar_lea.vmem [#allocation11], %s741_s29  ;;  %s1415_s19 = scalar_lea.hbm %s1499_s5, %s761_s17 }
  0xa2   : > { %vm463_vm2 = vcmp.lt.s32.totalorder %v459_v46, 1  ;;  %vm466_vm3 = vcmp.ge.s32.totalorder %v459_v46, 1  ;;  %vm492_vm4 = vcmp.lt.s32.totalorder %v459_v46, 7  ;;  %s569_s12 = sshll.u32 %s325_s20, 4  ;;  %s551_s26 = scalar_lea.sflag [#allocation4], %s1388_s14  ;;  %s1417_s12 = int_to_ptr.vmem [resolvable:$true] %s569_s12 }
  0xa3   : > { %341 = vadd.xlane.f32.xlu0 %v340_v3  ;;  %v485_v55 = vrot.slane %v457_v49, %v484_v47  ;;  %v506_v56 = vrot.slane %v457_v49, %v505_v48  ;;  %v477_v58 = vrot.slane %v457_v49, %v476_v52  ;;  %vm496_vm5 = vcmp.lt.s32.totalorder %v460_v51, 15  ;;  %s1026_s9 = scalar_lea.vmem %s1417_s12, 128  ;;  %s1146_s10 = smov [#allocation11]  }
  0xa4   : > { %p1027_p4 = scmp.ne.s32.totalorder %s1417_s12, %s1026_s9  ;;  %s1030_s11 = sshll.u32 %s1146_s10, 4  ;;  %s1031_s11 = int_to_ptr.vmem [resolvable:$false] %s1030_s11 }
  0xa5   : > { %s1032_s15 = scalar_lea.vmem %s1031_s11, 256  ;;  %p1033_p3 = scmp.lt.s32.totalorder %s1417_s12, %s1031_s11 }
  0xa6   : > { %p1028_p6 = pnand %p1027_p4, %p1336_p1  ;;  %p1034_p7 = scmp.lt.s32.totalorder %s1032_s15, %s1026_s9 }
  0xa8   : > { %p1029_p8 = pneg %p1028_p6  ;;  %p1035_p9 = por %p1034_p7, %p1033_p3 }
  0xaa   : > { %p1036_p12 = pnand %p1035_p9, %p1029_p8 }
 0x12c   : > { %v339_v4 = vpop.xlane.xlu0 %338 }
 0x12d   : > { %v344_v5 = vmul.f32 0.0625, %v339_v4 }
 0x12f   : > { %v346_v6 = vsub.f32 %v334_v0, %v344_v5 }
 0x130   : > { %v342_v7 = vpop.xlane.xlu0 %341 }
 0x131   : > { %v345_v8 = vmul.f32 0.0625, %v342_v7  ;;  %v348_v9 = vmul.f32 %v346_v6, %v346_v6 }
 0x133   : > { %v347_v10 = vsub.f32 %v335_v1, %v345_v8  ;;  %v350_v11 = vsel %vm336_vm0, %v348_v9, 0.0 }
 0x134   : > { %351 = vadd.xlane.f32.xlu1 %v350_v11 }
 0x135   : > { %v349_v12 = vmul.f32 %v347_v10, %v347_v10 }
 0x137   : > { %v353_v13 = vsel %vm336_vm0, %v349_v12, 0.0 }
 0x138   : > { %354 = vadd.xlane.f32.xlu1 %v353_v13 }
 0x1c1   : > { %v352_v16 = vpop.xlane.xlu1 %351 }
 0x1c2   : > { %v356_v17 = vmul.f32 0.0625, %v352_v16 }
 0x1c4   : > { %v358_v18 = vadd.f32 1e-05, %v356_v17 }
 0x1c5   : > { %v355_v19 = vpop.xlane.xlu1 %354 }
 0x1c6   : > { %872 = vrsqrt.f32 %v358_v18  ;;  %v357_v20 = vmul.f32 0.0625, %v355_v19 }
 0x1c8   : > { %v359_v21 = vadd.f32 1e-05, %v357_v20 }
 0x1ca   : > { %874 = vrsqrt.f32 %v359_v21 }
 0x1d0   : > { %v873_v22 = vpop.eup %872 }
 0x1d1   : > { %v362_v23 = vmul.f32 %v873_v22, %v346_v6 }
 0x1d3   : > { %v371_v27 = vmul.f32 %v743_v24, %v362_v23 }
 0x1d4   : > { %v875_v25 = vpop.eup %874 }
 0x1d5   : > { %v363_v26 = vmul.f32 %v875_v25, %v347_v10  ;;  %v380_v30 = vadd.f32 %v744_v28, %v371_v27 }
 0x1d7   : > { %v372_v29 = vmul.f32 %v743_v24, %v363_v26 }
 0x1d9   : > { %v381_v31 = vadd.f32 %v744_v28, %v372_v29 }
 0x1db   : > { %v382_v32 = vpack.c.bf16 %v381_v31, %v380_v30 }
 0x1dd   : > { %767 = vmatmul.mubr.msk.bf16.vlgmr.msra.gmra.mrb[0].mxu0 %vm336_vm0, %v382_v32 }
 0x2b0   : > { %v428_v33 = vpop.f32.mrb[0].mxu0 }
 0x2b1   : > { %v747_v34 = vmul.f32 -1.442695, %v428_v33  ;;  %v768_v35 = vpop.f32.mrb[1].mxu0 }
 0x2b2   : > { %v431_v36 = vpop.f32.mrb[2].mxu0 }
 0x2b3   : > { %876 = vpow2.f32 %v747_v34  ;;  %v748_v37 = vmul.f32 -1.442695, %v431_v36  ;;  %v769_v38 = vpop.f32.mrb[3].mxu0 }
 0x2b5   : > { %878 = vpow2.f32 %v748_v37 }
 0x2bd   : > { %v877_v39 = vpop.eup %876 }
 0x2be   : > { %v441_v40 = vadd.f32 1.0, %v877_v39 }
 0x2bf   : > { %v879_v41 = vpop.eup %878 }
 0x2c0   : > { %880 = vrcp.f32 %v441_v40  ;;  %v442_v42 = vadd.f32 1.0, %v879_v41 }
 0x2c2   : > { %882 = vrcp.f32 %v442_v42 }
 0x2ca   : > { %v881_v43 = vpop.eup %880 }
 0x2cb   : > { %449 = vrot.lane.b32.xlu0 %v881_v43, %s1145_s27 }
 0x2cc   : > { %v883_v44 = vpop.eup %882 }
 0x2cd   : > { %451 = vrot.lane.b32.xlu1 %v883_v44, %s1145_s27 }
 0x33d   : > { %v450_v50 = vpop.permute.xlu0 %449 }
 0x33e   : > { %v455_v53 = vmul.f32 %v450_v50, %v428_v33 }
 0x33f   : > { %v452_v54 = vpop.permute.xlu1 %451 }
 0x340   : > { %v456_v57 = vmul.f32 %v452_v54, %v431_v36  ;;  %v461_v59 = vrot.slane %v455_v53, 7  ;;  %v490_v60 = vrot.slane %v455_v53, 1  ;;  %v486_v7 = vmul.f32 %v485_v55, %v455_v53 }
 0x342   : > { %v462_v61 = vrot.slane %v456_v57, 7  ;;  %v491_v62 = vrot.slane %v456_v57, 1  ;;  %v487_v5 = vmul.f32 %v485_v55, %v456_v57 }
 0x344   : > { %v464_v63 = vsel %vm463_vm2, %v461_v59, %v462_v61  ;;  %v465_v0 = vsel %vm463_vm2, %v462_v61, %v461_v59  ;;  %v493_v1 = vsel %vm492_vm4, %v490_v60, %v491_v62  ;;  %v494_v2 = vsel %vm492_vm4, %v491_v62, %v490_v60 }
 0x345   : > { %v472_v3 = vsel %vm466_vm3, %v465_v0, 0.0  ;;  %v479_v4 = vmul.f32 %v477_v58, %v464_v63  ;;  %v502_v6 = vsel %vm496_vm5, %v494_v2, 0.0  ;;  %v507_v12 = vmul.f32 %v506_v56, %v493_v1 }
 0x346   : > { %v478_v8 = vmul.f32 %v477_v58, %v472_v3  ;;  %v508_v9 = vmul.f32 %v506_v56, %v502_v6 }
 0x347   : > { %v489_v10 = vadd.f32 %v487_v5, %v479_v4 }
 0x348   : > { %v488_v11 = vadd.f32 %v486_v7, %v478_v8 }
 0x349   : > { %v510_v13 = vadd.f32 %v508_v9, %v489_v10 }
 0x34a   : > { %v509_v14 = vadd.f32 %v507_v12, %v488_v11 }
 0x34b   : > { %v760_v15 = vpack.c.bf16 %v510_v13, %v510_v13  ;;  %v524_v16 = vsel %vm522_vm6, %v510_v13, 0.0 }
 0x34c   : > { %v759_v17 = vpack.c.bf16 %v509_v14, %v509_v14  ;;  %v523_v18 = vsel %vm522_vm6, %v509_v14, 0.0 }
 0x34d   : > { %v525_v19 = vadd.f32 %v524_v16, %v523_v18  ;;  %521 = vst.msk [vmem:[%s325_s20 + $0x4] sm:$0xf] %vm519_vm7, %v760_v15 }
 0x34e   : > { %520 = vst.msk [vmem:[%s325_s20] sm:$0xf] %vm519_vm7, %v759_v17 }
 0x34f   : > { %v526_v20 = vrot.slane %v525_v19, 4 }
 0x350   : > { %1039 = shalt.err (!%p1036_p12)
}
 0x351   : > { %s1040_s13 = scalar_lea.hbm %s1415_s19, 128  ;;  %s1044_s17 = scalar_lea.hbm %s1499_s5, 512 }
 0x352   : > { %p1041_p0 = scmp.ne.s32.totalorder %s1415_s19, %s1040_s13  ;;  %p1045_p10 = scmp.lt.u32.totalorder %s1415_s19, %s1499_s5 }
 0x353   : > { %p1046_p13 = scmp.lt.u32.totalorder %s1044_s17, %s1040_s13  ;;  %p1048_p4 = scmp.lt.u32.totalorder %s1040_s13, %s1415_s19 }
 0x354   : > { %p1042_p5 = pnand %p1041_p0, %p1336_p1 }
 0x355   : > { %p1047_p2 = por %p1046_p13, %p1045_p10 }
 0x356   : > { %p1043_p11 = pneg %p1042_p5 }
 0x357   : > { %p1049_p6 = por %p1048_p4, %p1047_p2 }
 0x359   : > { %p1050_p8 = pnand %p1049_p6, %p1043_p11 }
 0x35b   : > { %1053 = shalt.err (!%p1050_p8)
}
 0x35c   : > { %s1147_s16 = smov 64   ;;  %s1148_s9 = smov 4   ;;  %v527_v21 = vadd.f32 %v526_v20, %v525_v19  ;;  %vm546_vm8 = vcmask 1040384   ;;  %vm548_vm9 = vcmask 254976  }
 0x35d   : > { %788 = dma.vmem_to_hbm [thread:$0]  (%p1336_p1), %s1417_s12, 128, %s1415_s19, %s551_s26, %s1147_s16, %s1147_s16, %s1148_s9  }
 0x35e   : > { %v528_v22 = vrot.slane %v527_v21, 2  ;;  %s742_s10 = sshll.u32 %s1388_s14, 1  ;;  %s755_s12 = sshll.u32 %s1206_s25, 5 }
 0x35f   : > { %s332_s19 = scalar_lea.vmem [#allocation12], %s742_s10  ;;  %s1451_s13 = scalar_lea.hbm %s1500_s6, %s755_s12 }
 0x360   : > { %v529_v23 = vadd.f32 %v528_v22, %v527_v21  ;;  %s585_s26 = sshll.u32 %s332_s19, 4  ;;  %s556_s27 = scalar_lea.sflag [#allocation13], %s1388_s14  ;;  %s1453_s26 = int_to_ptr.vmem [resolvable:$true] %s585_s26 }
 0x361   : > { %s1054_s29 = scalar_lea.vmem %s1453_s26, 32  ;;  %s1149_s25 = smov [#allocation12]  }
 0x362   : > { %v530_v24 = vrot.slane %v529_v23, 1  ;;  %p1055_p3 = scmp.ne.s32.totalorder %s1453_s26, %s1054_s29  ;;  %s1058_s17 = sshll.u32 %s1149_s25, 4  ;;  %s1059_s17 = int_to_ptr.vmem [resolvable:$false] %s1058_s17 }
 0x363   : > { %s1060_s20 = scalar_lea.vmem %s1059_s17, 64  ;;  %p1061_p12 = scmp.lt.s32.totalorder %s1453_s26, %s1059_s17 }
 0x364   : > { %v531_v25 = vadd.f32 %v530_v24, %v529_v23  ;;  %p1056_p7 = pnand %p1055_p3, %p1336_p1  ;;  %p1062_p0 = scmp.lt.s32.totalorder %s1060_s20, %s1054_s29 }
 0x366   : > { %v532_v26 = vmul.f32 0.0625, %v531_v25  ;;  %p1057_p9 = pneg %p1056_p7  ;;  %p1063_p5 = por %p1062_p0, %p1061_p12 }
 0x368   : > { %v533_v27 = vsub.f32 %v509_v14, %v532_v26  ;;  %v534_v28 = vsub.f32 %v510_v13, %v532_v26  ;;  %p1064_p11 = pnand %p1063_p5, %p1057_p9 }
 0x36a   : > { %v535_v29 = vmul.f32 %v533_v27, %v533_v27  ;;  %v536_v30 = vmul.f32 %v534_v28, %v534_v28 }
 0x36c   : > { %v537_v31 = vsel %vm522_vm6, %v535_v29, 0.0  ;;  %v538_v32 = vsel %vm522_vm6, %v536_v30, 0.0 }
 0x36d   : > { %v539_v33 = vadd.f32 %v538_v32, %v537_v31 }
 0x36f   : > { %v540_v34 = vrot.slane %v539_v33, 4 }
 0x371   : > { %v541_v35 = vadd.f32 %v540_v34, %v539_v33 }
 0x373   : > { %v542_v36 = vrot.slane %v541_v35, 2 }
 0x375   : > { %v543_v37 = vadd.f32 %v542_v36, %v541_v35 }
 0x377   : > { %v544_v38 = vrot.slane %v543_v37, 1 }
 0x379   : > { %v545_v39 = vadd.f32 %v544_v38, %v543_v37 }
 0x37b   : > { %v547_v40 = vsel %vm546_vm8, %v532_v26, %v545_v39 }
 0x37c   : > { %549 = vst.msk [vmem:[%s332_s19] sm:$0x3] %vm548_vm9, %v547_v40 }
 0x37d   : > { %1067 = shalt.err (!%p1064_p11)
}
 0x37e   : > { %s1068_s14 = scalar_lea.hbm %s1451_s13, 32  ;;  %s1072_s9 = scalar_lea.hbm %s1500_s6, 128 }
 0x37f   : > { %p1069_p10 = scmp.ne.s32.totalorder %s1451_s13, %s1068_s14  ;;  %p1073_p4 = scmp.lt.u32.totalorder %s1451_s13, %s1500_s6 }
 0x380   : > { %p1074_p6 = scmp.lt.u32.totalorder %s1072_s9, %s1068_s14  ;;  %p1076_p3 = scmp.lt.u32.totalorder %s1068_s14, %s1451_s13 }
 0x381   : > { %p1070_p13 = pnand %p1069_p10, %p1336_p1 }
 0x382   : > { %p1075_p8 = por %p1074_p6, %p1073_p4 }
 0x383   : > { %p1071_p2 = pneg %p1070_p13 }
 0x384   : > { %p1077_p7 = por %p1076_p3, %p1075_p8 }
 0x386   : > { %p1078_p9 = pnand %p1077_p7, %p1071_p2 }
 0x388   : > { %1081 = shalt.err (!%p1078_p9)
}
 0x389   : > { %789 = dma.vmem_to_hbm [thread:$0]  (%p1336_p1), %s1453_s26, 32, %s1451_s13, %s556_s27  }
 0x38a PF: > { %p825_p12 = scmp.ge.s32.totalorder %s1132_s24, 2  ;;  %s597_s19 = sand.u32 1, %s1120_s21  }
 0x38b   : > { %p1518_p0 = scmp.ne.s32.totalorder %s1505_s28, 0  ;;  %s598_s11 = scalar_lea.sflag [#allocation4], %s597_s19 }
 0x38d   : > { %p810_p5 = pnand %p825_p12, %p1518_p0 }
 0x38f   : > { %1111 = dma.done.wait (!%p810_p5), %s598_s11, 128  }
 0x390   : > { %1113 = vsyncadd (!%p810_p5), %s598_s11, 4294967168  ;;  %s607_s15 = scalar_lea.sflag [#allocation13], %s597_s19 }
 0x391   : > { %1115 = dma.done.wait (!%p810_p5), %s607_s15, 32  }
 0x392   : > { %1117 = vsyncadd (!%p810_p5), %s607_s15, 4294967264  ;;  %p25_p1 = scmp.ge.s32.totalorder %s1326_s18, 6   ;;  %s1519_s21 = smov %s1124_s22 }
 0x393   : > { %s1520_s22 = smov %s1128_s23  ;;  %s1521_s23 = smov %s1342_s8 }
 0x394   : > { %s1522_s24 = smov %s1326_s18  ;;  %27 = sbr.rel (!%p25_p1) target bundleno = 9 (0x9), region = 118 }
 0x39b   :  { %612 = vsyncpa [#allocation3], 1 }
 0x39c   :  { %614 = vsyncpa [#allocation3 + $0x1], 1 }
 0x39d   :  { %615 = vsyncpa [#allocation6], 1 }
 0x39e   :  { %616 = vsyncpa [#allocation9], 1 }
 0x39f   :  { %617 = vsyncpa [#allocation4], 1 }
 0x3a0   :  { %619 = vsyncpa [#allocation4 + $0x1], 1 }
 0x3a1   :  { %620 = vsyncpa [#allocation13], 1 }
 0x3a2   :  { %622 = vsyncpa [#allocation13 + $0x1], 1 }

// kernel: convolution_module_forward.3
= control target key start
LH: loop header
LB: loop body
LE: loop exit
PB: predicated region body
PF: predicated region fallthrough
CT: control target
= control target key end

     0   :  { %9 = vsyncpa [#allocation3], 0  ;;  %s641_s0 = inlined_call_operand.hbm [shape: bf16[64,32], index: 0, kind: input, shape index: {}]   ;;  %s642_s1 = inlined_call_operand.hbm [shape: f32[1,32], index: 1, kind: input, shape index: {}]   ;;  %s643_s2 = inlined_call_operand.hbm [shape: f32[1,32], index: 2, kind: input, shape index: {}]   ;;  %s644_s3 = inlined_call_operand.hbm [shape: bf16[32,32], index: 3, kind: input, shape index: {}]   ;;  %s645_s4 = inlined_call_operand.hbm [shape: f32[64,32], index: 4, kind: output, shape index: {}]  }
   0x1   :  { %10 = vsyncpa [#allocation6], 0 }
   0x2   :  { %11 = vsyncpa [#allocation9], 0 }
   0x3   :  { %12 = vsyncpa [#allocation4], 0  ;;  %s515_s15 = smov [#allocation5]   ;;  %s516_s17 = smov [#allocation2]  }
   0x4   :  { %s31_s16 = sshll.u32 %s515_s15, 4  ;;  %s18_s18 = sshll.u32 %s516_s17, 4  ;;  %s32_s16 = int_to_ptr.vmem [resolvable:$true] %s31_s16  ;;  %s549_s18 = int_to_ptr.vmem [resolvable:$true] %s18_s18 }
   0x5   :  { %s397_s21 = scalar_lea.hbm %s642_s1, 16 }
   0x6   :  { %p398_p0 = scmp.ne.s32.totalorder %s642_s1, %s397_s21  ;;  %p401_p1 = scmp.lt.u32.totalorder %s397_s21, %s642_s1 }
   0x8   :  { %p403_p2 = pnand %p401_p1, %p398_p0 }
   0xa   :  { %406 = shalt.err (!%p403_p2)
}
   0xb   :  { %s407_s26 = scalar_lea.vmem %s32_s16, 16  ;;  %s411_s27 = scalar_lea.vmem %s32_s16, 32 }
   0xc   :  { %p408_p3 = scmp.ne.s32.totalorder %s32_s16, %s407_s26  ;;  %p412_p4 = scmp.lt.s32.totalorder %s32_s16, %s32_s16 }
   0xd   :  { %p413_p5 = scmp.lt.s32.totalorder %s411_s27, %s407_s26 }
   0xf   :  { %p414_p6 = por %p413_p5, %p412_p4 }
  0x11   :  { %p415_p7 = pnand %p414_p6, %p408_p3 }
  0x13   :  { %418 = shalt.err (!%p415_p7)
}
  0x14   :  { %34 = dma.hbm_to_vmem [thread:$0]  %s642_s1, 16, %s32_s16, [#allocation6]  }
  0x15   :  { %s419_s6 = scalar_lea.hbm %s641_s0, 512 }
  0x16   :  { %p420_p8 = scmp.ne.s32.totalorder %s641_s0, %s419_s6  ;;  %p423_p9 = scmp.lt.u32.totalorder %s419_s6, %s641_s0 }
  0x18   :  { %p425_p10 = pnand %p423_p9, %p420_p8 }
  0x1a   :  { %428 = shalt.err (!%p425_p10)
}
  0x1b   :  { %s429_s11 = scalar_lea.vmem %s549_s18, 512  ;;  %p434_p12 = scmp.lt.s32.totalorder %s549_s18, %s549_s18 }
  0x1c   :  { %p430_p11 = scmp.ne.s32.totalorder %s549_s18, %s429_s11  ;;  %p435_p13 = scmp.lt.s32.totalorder %s429_s11, %s429_s11 }
  0x1e   :  { %p436_p0 = por %p435_p13, %p434_p12 }
  0x20   :  { %p437_p1 = pnand %p436_p0, %p430_p11 }
  0x22   :  { %440 = shalt.err (!%p437_p1)
}
  0x23   :  { %s517_s1 = smov 64   ;;  %s518_s12 = smov 4  }
  0x24   :  { %24 = dma.hbm_to_vmem [thread:$0]  %s641_s0, 512, %s549_s18, [#allocation3], %s517_s1, %s517_s1, %s518_s12  }
  0x25   :  { %s519_s15 = smov [#allocation7]   ;;  %s520_s17 = smov [#allocation8]  }
  0x26   :  { %s41_s16 = sshll.u32 %s519_s15, 4  ;;  %s50_s19 = sshll.u32 %s520_s17, 4  ;;  %s42_s16 = int_to_ptr.vmem [resolvable:$true] %s41_s16  ;;  %s583_s19 = int_to_ptr.vmem [resolvable:$true] %s50_s19 }
  0x27   :  { %s441_s22 = scalar_lea.hbm %s643_s2, 16 }
  0x28   :  { %p442_p2 = scmp.ne.s32.totalorder %s643_s2, %s441_s22  ;;  %p445_p3 = scmp.lt.u32.totalorder %s441_s22, %s643_s2 }
  0x2a   :  { %p447_p4 = pnand %p445_p3, %p442_p2 }
  0x2c   :  { %450 = shalt.err (!%p447_p4)
}
  0x2d   :  { %s451_s0 = scalar_lea.vmem %s42_s16, 16  ;;  %s455_s18 = scalar_lea.vmem %s42_s16, 32 }
  0x2e   :  { %p452_p5 = scmp.ne.s32.totalorder %s42_s16, %s451_s0  ;;  %p456_p6 = scmp.lt.s32.totalorder %s42_s16, %s42_s16 }
  0x2f   :  { %p457_p7 = scmp.lt.s32.totalorder %s455_s18, %s451_s0 }
  0x31   :  { %p458_p8 = por %p457_p7, %p456_p6 }
  0x33   :  { %p459_p9 = pnand %p458_p8, %p452_p5 }
  0x35   :  { %462 = shalt.err (!%p459_p9)
}
  0x36   :  { %44 = dma.hbm_to_vmem [thread:$0]  %s643_s2, 16, %s42_s16, [#allocation6]  }
  0x37   :  { %s463_s5 = scalar_lea.hbm %s644_s3, 256 }
  0x38   :  { %p464_p10 = scmp.ne.s32.totalorder %s644_s3, %s463_s5  ;;  %p467_p11 = scmp.lt.u32.totalorder %s463_s5, %s644_s3 }
  0x3a   :  { %p469_p12 = pnand %p467_p11, %p464_p10 }
  0x3c   :  { %472 = shalt.err (!%p469_p12)
}
  0x3d   :  { %s473_s10 = scalar_lea.vmem %s583_s19, 256  ;;  %p478_p0 = scmp.lt.s32.totalorder %s583_s19, %s583_s19 }
  0x3e   :  { %p474_p13 = scmp.ne.s32.totalorder %s583_s19, %s473_s10  ;;  %p479_p1 = scmp.lt.s32.totalorder %s473_s10, %s473_s10 }
  0x40   :  { %p480_p2 = por %p479_p1, %p478_p0 }
  0x42   :  { %p481_p3 = pnand %p480_p2, %p474_p13 }
  0x44   :  { %484 = shalt.err (!%p481_p3)
}
  0x45   :  { %56 = dma.hbm_to_vmem [thread:$0]  %s644_s3, 256, %s583_s19, [#allocation9], %s517_s1, %s517_s1, %s518_s12  }
  0x46   :  { %507 = dma.done.wait [#allocation3], 512  }
  0x47   :  { %508 = vsyncadd [#allocation3], 4294966784 }
  0x48   :  { %509 = dma.done.wait [#allocation6], 32  }
  0x49   :  { %510 = vsyncadd [#allocation6], 4294967264 }
  0x4a   :  { %511 = dma.done.wait [#allocation9], 256  }
  0x4b   :  { %512 = vsyncadd [#allocation9], 4294967040  ;;  %v363_v0 = vld [vmem:[#allocation8] sm:$0xff]   ;;  %v364_v1 = vld [vmem:[#allocation8 + $0x8] sm:$0xff]   ;;  %vm192_vm0 = vcmask 261120   ;;  %s521_s3 = smov [#allocation10]  }
  0x4c   :  { %338 = vmatprep.subr.bf16.mxu0 %v363_v0  ;;  %350 = vmatprep.subr.bf16.mxu1 %v363_v0  ;;  %v314_v2 = vld [vmem:[#allocation2] sm:$0xff]   ;;  %v330_v6 = vld [vmem:[#allocation2 + $0x10] sm:$0xff]   ;;  %v329_v7 = vld [vmem:[#allocation2 + $0x8] sm:$0xff]   ;;  %s283_s1 = sshll.u32 %s521_s3, 4  ;;  %s284_s1 = int_to_ptr.vmem [resolvable:$true] %s283_s1 }
  0x4d   :  { %v297_v3 = vld [vmem:[#allocation5] ss:$0 sm:$0xff]  ;;  %339 = vmatpush3.bf16.msra.mxu0 %v363_v0  ;;  %352 = vmatpush3.bf16.msra.mxu1 %v363_v0  ;;  %v315_v4 = vunpack.c.l.bf16 %v314_v2  ;;  %v316_v5 = vunpack.c.h.bf16 %v314_v2  ;;  %v331_v8 = vld [vmem:[#allocation2 + $0x18] sm:$0xff]   ;;  %v298_v9 = vld [vmem:[#allocation7] ss:$0 sm:$0xff]  ;;  %v323_v10 = vunpack.c.l.bf16 %v330_v6  ;;  %v324_v11 = vunpack.c.h.bf16 %v330_v6  ;;  %s485_s12 = scalar_lea.vmem %s284_s1, 1024  ;;  %p490_p5 = scmp.lt.s32.totalorder %s284_s1, %s284_s1 }
  0x4e   :  { %340 = vmatprep.subr.bf16.mxu0 %v364_v1  ;;  %351 = vmatprep.subr.bf16.mxu1 %v364_v1  ;;  %v319_v12 = vunpack.c.l.bf16 %v329_v7  ;;  %v320_v13 = vunpack.c.h.bf16 %v329_v7  ;;  %v327_v16 = vunpack.c.l.bf16 %v331_v8  ;;  %v328_v17 = vunpack.c.h.bf16 %v331_v8  ;;  %p486_p4 = scmp.ne.s32.totalorder %s284_s1, %s485_s12  ;;  %p491_p6 = scmp.lt.s32.totalorder %s485_s12, %s485_s12 }
  0x4f   :  { %v93_v14 = vmul.f32 %v315_v4, %v297_v3  ;;  %v94_v15 = vmul.f32 %v316_v5, %v297_v3  ;;  %v97_v18 = vmul.f32 %v323_v10, %v297_v3  ;;  %v98_v19 = vmul.f32 %v324_v11, %v297_v3 }
  0x50   :  { %v95_v20 = vmul.f32 %v319_v12, %v297_v3  ;;  %v96_v21 = vmul.f32 %v320_v13, %v297_v3  ;;  %v99_v24 = vmul.f32 %v327_v16, %v297_v3  ;;  %v100_v31 = vmul.f32 %v328_v17, %v297_v3  ;;  %p492_p7 = por %p491_p6, %p490_p5 }
  0x51   :  { %341 = vmatpush3.bf16.msra.mxu0 %v364_v1  ;;  %353 = vmatpush3.bf16.msra.mxu1 %v364_v1  ;;  %v108_v22 = vadd.f32 %v298_v9, %v93_v14  ;;  %v109_v23 = vadd.f32 %v298_v9, %v94_v15  ;;  %v112_v25 = vadd.f32 %v298_v9, %v97_v18 }
  0x52   :  { %v113_v26 = vadd.f32 %v298_v9, %v98_v19  ;;  %v110_v27 = vadd.f32 %v298_v9, %v95_v20  ;;  %v111_v28 = vadd.f32 %v298_v9, %v96_v21  ;;  %v114_v32 = vadd.f32 %v298_v9, %v99_v24  ;;  %p493_p8 = pnand %p492_p7, %p486_p4 }
  0x53   :  { %v299_v29 = vmul.f32 -1.442695, %v108_v22  ;;  %v300_v30 = vmul.f32 -1.442695, %v109_v23  ;;  %v303_v33 = vmul.f32 -1.442695, %v112_v25  ;;  %v115_v36 = vadd.f32 %v298_v9, %v100_v31 }
  0x54   :  { %v304_v34 = vmul.f32 -1.442695, %v113_v26  ;;  %v301_v35 = vmul.f32 -1.442695, %v110_v27  ;;  %v302_v37 = vmul.f32 -1.442695, %v111_v28 }
  0x55   :  { %365 = vpow2.f32 %v299_v29  ;;  %v305_v38 = vmul.f32 -1.442695, %v114_v32  ;;  %v306_v39 = vmul.f32 -1.442695, %v115_v36 }
  0x56   :  { %367 = vpow2.f32 %v300_v30 }
  0x57   :  { %369 = vpow2.f32 %v303_v33 }
  0x58   :  { %371 = vpow2.f32 %v304_v34 }
  0x59   :  { %373 = vpow2.f32 %v301_v35 }
  0x5a   :  { %375 = vpow2.f32 %v302_v37 }
  0x5b   :  { %377 = vpow2.f32 %v305_v38 }
  0x5c   :  { %379 = vpow2.f32 %v306_v39 }
  0x5f   :  { %v366_v40 = vpop.eup %365 }
  0x60   :  { %v368_v41 = vpop.eup %367  ;;  %v140_v42 = vadd.f32 1.0, %v366_v40 }
  0x61   :  { %v370_v43 = vpop.eup %369  ;;  %v141_v44 = vadd.f32 1.0, %v368_v41 }
  0x62   :  { %v372_v45 = vpop.eup %371  ;;  %381 = vrcp.f32 %v140_v42  ;;  %v144_v46 = vadd.f32 1.0, %v370_v43 }
  0x63   :  { %v374_v47 = vpop.eup %373  ;;  %383 = vrcp.f32 %v141_v44  ;;  %v145_v48 = vadd.f32 1.0, %v372_v45 }
  0x64   :  { %v376_v49 = vpop.eup %375  ;;  %385 = vrcp.f32 %v144_v46  ;;  %v142_v50 = vadd.f32 1.0, %v374_v47 }
  0x65   :  { %v378_v51 = vpop.eup %377  ;;  %387 = vrcp.f32 %v145_v48  ;;  %v143_v52 = vadd.f32 1.0, %v376_v49 }
  0x66   :  { %v380_v53 = vpop.eup %379  ;;  %389 = vrcp.f32 %v142_v50  ;;  %v146_v54 = vadd.f32 1.0, %v378_v51 }
  0x67   :  { %391 = vrcp.f32 %v143_v52  ;;  %v147_v55 = vadd.f32 1.0, %v380_v53 }
  0x68   :  { %393 = vrcp.f32 %v146_v54 }
  0x69   :  { %395 = vrcp.f32 %v147_v55 }
  0x6c   :  { %v382_v56 = vpop.eup %381 }
  0x6d   :  { %v384_v57 = vpop.eup %383  ;;  %v164_v58 = vmul.f32 %v382_v56, %v108_v22 }
  0x6e   :  { %v386_v59 = vpop.eup %385  ;;  %v165_v60 = vmul.f32 %v384_v57, %v109_v23 }
  0x6f   :  { %v388_v61 = vpop.eup %387  ;;  %v168_v62 = vmul.f32 %v386_v59, %v112_v25 }
  0x70   :  { %v390_v63 = vpop.eup %389  ;;  %v172_v0 = vpack.c.bf16 %v165_v60, %v164_v58  ;;  %v169_v1 = vmul.f32 %v388_v61, %v113_v26 }
  0x71   :  { %v392_v2 = vpop.eup %391  ;;  %v166_v3 = vmul.f32 %v390_v63, %v110_v27 }
  0x72   :  { %v394_v4 = vpop.eup %393  ;;  %342 = vmatprep.mubr.msk.bf16.mxu0 %vm192_vm0, %v172_v0  ;;  %v174_v5 = vpack.c.bf16 %v169_v1, %v168_v62  ;;  %v167_v6 = vmul.f32 %v392_v2, %v111_v28 }
  0x73   :  { %v396_v7 = vpop.eup %395  ;;  %v170_v8 = vmul.f32 %v394_v4, %v114_v32 }
  0x74   :  { %346 = vmatprep.mubr.msk.bf16.mxu1 %vm192_vm0, %v174_v5  ;;  %v173_v9 = vpack.c.bf16 %v167_v6, %v166_v3  ;;  %v171_v10 = vmul.f32 %v396_v7, %v115_v36 }
  0x76   :  { %343 = vmatmul.mubr.msk.bf16.vlgmr.msra.gmra.mrb[0].mxu0 %vm192_vm0, %v173_v9  ;;  %v175_v11 = vpack.c.bf16 %v171_v10, %v170_v8 }
  0x78   :  { %347 = vmatmul.mubr.msk.bf16.vlgmr.msra.gmra.mrb[0].mxu1 %vm192_vm0, %v175_v11 }
 0x149   :  { %v344_v12 = vpop.f32.mrb[0].mxu0 }
 0x14a   :  { %272 = vst.msk [vmem:[#allocation10 + $0x10] sm:$0xff] %vm192_vm0, %v344_v12  ;;  %v239_v13 = vpop.f32.mrb[1].mxu0 }
 0x14b   :  { %v348_v14 = vpop.f32.mrb[0].mxu1  ;;  %270 = vst.msk [vmem:[#allocation10] sm:$0xff] %vm192_vm0, %v239_v13  ;;  %v345_v15 = vpop.f32.mrb[2].mxu0 }
 0x14c   :  { %276 = vst.msk [vmem:[#allocation10 + $0x30] sm:$0xff] %vm192_vm0, %v348_v14  ;;  %v255_v16 = vpop.f32.mrb[1].mxu1  ;;  %273 = vst.msk [vmem:[#allocation10 + $0x18] sm:$0xff] %vm192_vm0, %v345_v15  ;;  %v242_v17 = vpop.f32.mrb[3].mxu0 }
 0x14d   :  { %274 = vst.msk [vmem:[#allocation10 + $0x20] sm:$0xff] %vm192_vm0, %v255_v16  ;;  %v349_v18 = vpop.f32.mrb[2].mxu1  ;;  %271 = vst.msk [vmem:[#allocation10 + $0x8] sm:$0xff] %vm192_vm0, %v242_v17 }
 0x14e   :  { %277 = vst.msk [vmem:[#allocation10 + $0x38] sm:$0xff] %vm192_vm0, %v349_v18  ;;  %v258_v19 = vpop.f32.mrb[3].mxu1 }
 0x14f   :  { %275 = vst.msk [vmem:[#allocation10 + $0x28] sm:$0xff] %vm192_vm0, %v258_v19 }
 0x150   :  { %496 = shalt.err (!%p493_p8)
}
 0x151   :  { %s497_s15 = scalar_lea.hbm %s645_s4, 1024 }
 0x152   :  { %p498_p9 = scmp.ne.s32.totalorder %s645_s4, %s497_s15  ;;  %p501_p10 = scmp.lt.u32.totalorder %s497_s15, %s645_s4 }
 0x154   :  { %p503_p11 = pnand %p501_p10, %p498_p9 }
 0x156   :  { %506 = shalt.err (!%p503_p11)
}
 0x157   :  { %s522_s21 = smov 128   ;;  %s523_s22 = smov 8  }
 0x158   :  { %289 = dma.vmem_to_hbm [thread:$0]  %s284_s1, 1024, %s645_s4, [#allocation4], %s522_s21, %s522_s21, %s523_s22  }
 0x159   :  { %513 = dma.done.wait [#allocation4], 1024  }
 0x15a   :  { %514 = vsyncadd [#allocation4], 4294966272 }
 0x15b   :  { %293 = vsyncpa [#allocation3], 1 }
 0x15c   :  { %294 = vsyncpa [#allocation6], 1 }
 0x15d   :  { %295 = vsyncpa [#allocation9], 1 }
 0x15e   :  { %296 = vsyncpa [#allocation4], 1 }

</bundles_post_ra>
